<compile_context>
chip_gen: v5e
topology: v5e:2x2
jax: 0.10.0
libtpu: 0.0.40
codegen_flags: <defaults>
</compile_context>

<pallas_src>
import jax
import jax.numpy as jnp
from jax.experimental import pallas as pl
from jax.experimental.pallas import tpu as pltpu


def _score_matching_kernel(score_ref, noise_ref, inv_sigma_ref, rowsum_ref):
    """Process one (TILE_B, TILE_N) tile; accumulate per-row sum of sq. error.

    target = -noise / sigma  ->  diff = score - target = score + noise * (1/sigma)
    rowsum_ref is a (TILE_B, 1) f32 block resident across the N-tile grid axis.
    """
    ni = pl.program_id(1)

    @pl.when(ni == 0)
    def _():
        rowsum_ref[...] = jnp.zeros_like(rowsum_ref)

    s = score_ref[...].astype(jnp.float32)
    n = noise_ref[...].astype(jnp.float32)
    diff = s + n * inv_sigma_ref[...]                      # (TILE_B, TILE_N) f32
    rowsum_ref[...] += jnp.sum(diff * diff, axis=1, keepdims=True)


def _pick_tile(dim, candidates):
    """Largest candidate tile that exactly divides `dim`, else the full dim."""
    for c in candidates:
        if c <= dim and dim % c == 0:
            return c
    return dim


def score_matching_loss(score, x, sigma, key, sigma_min=0.01, sigma_max=50.0):
    """JAX/Pallas equivalent of ScoreMatchingLoss.forward.

    Args:
      score: [B, C, H, W] predicted score (NCHW, like PyTorch).
      x:     [B, C, H, W] input data (only shape/dtype matter for the noise).
      sigma: [B] noise levels.
      key:   PRNG key standing in for torch.randn_like.
    Returns:
      scalar loss (float32).
    """
    B, C, H, W = x.shape
    N = C * H * W

    # torch.randn_like(x) counterpart, generated in the model's native dtype so
    # the kernel streams bf16/f16 directly (no full-size f32 copies in HBM).
    # TODO(synk): generate the noise in-kernel (pltpu.prng_seed +
    # pltpu.prng_random_bits + Box-Muller) to remove this HBM stream entirely;
    # it would no longer match jax.random.normal bit-for-bit.
    noise = jax.random.normal(key, x.shape, dtype=x.dtype)

    # Reshape of a contiguous array is metadata-only (no HBM copy).
    score_2d = score.reshape(B, N)
    noise_2d = noise.reshape(B, N)
    # Tiny per-sample reciprocal so the inner loop is mul, not divide.
    inv_sigma = (1.0 / sigma.astype(jnp.float32)).reshape(B, 1)

    # Tile sizes: lane dim a multiple of 128, ~0.25-1 MiB per buffer so
    # 2 inputs x 2 pipeline buffers stay far below every generation's VMEM
    # budget (incl. v7x 64 MiB), while big enough to approach HBM roofline.
    tile_n = _pick_tile(N, (2048, 1024, 512, 256, 128))
    tile_b = _pick_tile(B, (128, 64, 32, 16, 8))
    grid = (B // tile_b, N // tile_n)          # reduction (feature) axis last

    row_sums = pl.pallas_call(
        _score_matching_kernel,
        out_shape=jax.ShapeDtypeStruct((B, 1), jnp.float32),
        grid_spec=pltpu.PrefetchScalarGridSpec(
            num_scalar_prefetch=0,
            grid=grid,
            in_specs=[
                pl.BlockSpec((tile_b, tile_n), lambda bi, ni: (bi, ni)),  # score
                pl.BlockSpec((tile_b, tile_n), lambda bi, ni: (bi, ni)),  # noise
                # inv_sigma block index constant along the N axis -> stays
                # resident in VMEM, no per-step re-DMA.
                pl.BlockSpec((tile_b, 1), lambda bi, ni: (bi, 0)),
            ],
            out_specs=pl.BlockSpec((tile_b, 1), lambda bi, ni: (bi, 0)),
        ),
        compiler_params=pltpu.CompilerParams(
            dimension_semantics=("parallel", "arbitrary")),
    )(score_2d, noise_2d, inv_sigma)

    # Tiny final reduction + mean in plain JAX (keeps the batch-tile grid axis
    # parallel, also improves accumulation accuracy for very large B*N).
    return jnp.sum(row_sums) / (B * N)


if __name__ == "__main__":
    key = jax.random.PRNGKey(0)
    k_score, k_x, k_sigma, k_noise = jax.random.split(key, 4)

    B, C, H, W = 2, 4, 16, 16
    sigma_min, sigma_max = 0.01, 50.0

    score = jax.random.normal(k_score, (B, C, H, W), dtype=jnp.float32)
    x = jax.random.normal(k_x, (B, C, H, W), dtype=jnp.float32)
    # log-uniform sigmas in [sigma_min, sigma_max], as in typical SDE training
    u = jax.random.uniform(k_sigma, (B,), dtype=jnp.float32)
    sigma = sigma_min * (sigma_max / sigma_min) ** u

    loss = score_matching_loss(score, x, sigma, k_noise,
                               sigma_min=sigma_min, sigma_max=sigma_max)
    loss = jax.block_until_ready(loss)

    # Pure-JAX reference (same noise key) to check the kernel math.
    noise = jax.random.normal(k_noise, x.shape, dtype=x.dtype)
    target = -noise / sigma.reshape(-1, 1, 1, 1)
    ref = jnp.mean((score - target) ** 2)
    assert jnp.allclose(loss, ref, rtol=1e-5, atol=1e-5), (loss, ref)

    print("KERNEL_OK")
</pallas_src>

<mosaic_0001>
module attributes {stable_mosaic.version = 11 : i64} {
  func.func @_score_matching_kernel(%arg0: i32, %arg1: i32, %arg2: memref<2x1024xf32, #tpu.memory_space<vmem>>, %arg3: memref<2x1024xf32, #tpu.memory_space<vmem>>, %arg4: memref<2x1xf32, #tpu.memory_space<vmem>>, %arg5: memref<2x1xf32, #tpu.memory_space<vmem>>) attributes {dimension_semantics = [#tpu.dimension_semantics<parallel>, #tpu.dimension_semantics<arbitrary>], iteration_bounds = array<i64: 1, 1>, scalar_prefetch = 0 : i64, scratch_operands = 0 : i64, tpu.core_type = #tpu.core_type<tc>, window_params = [{transform_indices = @transform_0, window_bounds = array<i64: 2, 1024>}, {transform_indices = @transform_1, window_bounds = array<i64: 2, 1024>}, {transform_indices = @transform_2, window_bounds = array<i64: 2, 1>}, {transform_indices = @transform_3, window_bounds = array<i64: 2, 1>}]} {
    %c0_i32 = arith.constant 0 : i32
    %0 = arith.cmpi eq, %arg1, %c0_i32 : i32
    %1 = arith.extui %0 : i1 to i32
    %c0_i32_0 = arith.constant 0 : i32
    %2 = arith.cmpi ne, %1, %c0_i32_0 : i32
    scf.if %2 {
      %cst_10 = arith.constant 0.000000e+00 : f32
      %15 = vector.broadcast %cst_10 : f32 to vector<2x1xf32>
      %c0_11 = arith.constant 0 : index
      %c0_12 = arith.constant 0 : index
      %16 = vector.load %arg5[%c0_11, %c0_12] : memref<2x1xf32, #tpu.memory_space<vmem>>, vector<2x1xf32>
      tpu.vector_store %arg5[%c0_11, %c0_12], %15 {strides = array<i32>} : memref<2x1xf32, #tpu.memory_space<vmem>>, vector<2x1xf32>,
    } else {
    }
    %c0 = arith.constant 0 : index
    %c0_1 = arith.constant 0 : index
    %3 = vector.load %arg2[%c0, %c0_1] : memref<2x1024xf32, #tpu.memory_space<vmem>>, vector<2x1024xf32>
    %c0_2 = arith.constant 0 : index
    %c0_3 = arith.constant 0 : index
    %4 = vector.load %arg3[%c0_2, %c0_3] : memref<2x1024xf32, #tpu.memory_space<vmem>>, vector<2x1024xf32>
    %c0_4 = arith.constant 0 : index
    %c0_5 = arith.constant 0 : index
    %5 = vector.load %arg4[%c0_4, %c0_5] : memref<2x1xf32, #tpu.memory_space<vmem>>, vector<2x1xf32>
    %6 = vector.broadcast %5 : vector<2x1xf32> to vector<2x1024xf32>
    %7 = arith.mulf %4, %6 : vector<2x1024xf32>
    %8 = arith.addf %3, %7 : vector<2x1024xf32>
    %c0_6 = arith.constant 0 : index
    %c0_7 = arith.constant 0 : index
    %9 = vector.load %arg5[%c0_6, %c0_7] : memref<2x1xf32, #tpu.memory_space<vmem>>, vector<2x1xf32>
    %10 = arith.mulf %8, %8 : vector<2x1024xf32>
    %cst = arith.constant dense<0.000000e+00> : vector<2xf32>
    %11 = vector.multi_reduction <add>, %10, %cst [1] : vector<2x1024xf32> to vector<2xf32>
    %12 = vector.shape_cast %11 : vector<2xf32> to vector<2x1xf32>
    %13 = arith.addf %9, %12 : vector<2x1xf32>
    %c0_8 = arith.constant 0 : index
    %c0_9 = arith.constant 0 : index
    %14 = vector.load %arg5[%c0_8, %c0_9] : memref<2x1xf32, #tpu.memory_space<vmem>>, vector<2x1xf32>
    tpu.vector_store %arg5[%c0_8, %c0_9], %13 {strides = array<i32>} : memref<2x1xf32, #tpu.memory_space<vmem>>, vector<2x1xf32>,
    return
  }
  func.func @transform_0(%arg0: i32, %arg1: i32) -> (i32, i32) {
    %c0_i32 = arith.constant 0 : i32
    return %arg0, %arg1 : i32, i32
  }
  func.func @transform_1(%arg0: i32, %arg1: i32) -> (i32, i32) {
    %c0_i32 = arith.constant 0 : i32
    return %arg0, %arg1 : i32, i32
  }
  func.func @transform_2(%arg0: i32, %arg1: i32) -> (i32, i32) {
    %c0_i32 = arith.constant 0 : i32
    %c0_i32_0 = arith.constant 0 : i32
    return %arg0, %c0_i32 : i32, i32
  }
  func.func @transform_3(%arg0: i32, %arg1: i32) -> (i32, i32) {
    %c0_i32 = arith.constant 0 : i32
    %c0_i32_0 = arith.constant 0 : i32
    return %arg0, %c0_i32 : i32, i32
  }
}

</mosaic_0001>

<bundles_post_ra>
// kernel: tpu_custom_call.1
= control target key start
LH: loop header
LB: loop body
LE: loop exit
PB: predicated region body
PF: predicated region fallthrough
CT: control target
= control target key end

     0   :  { %8 = vsyncpa [#allocation3], 0  ;;  %s228_s0 = inlined_call_operand.hbm [shape: f32[2,1024], index: 0, kind: input, shape index: {}]   ;;  %s229_s1 = inlined_call_operand.hbm [shape: f32[2,1024], index: 1, kind: input, shape index: {}]   ;;  %s230_s2 = inlined_call_operand.vmem [shape: f32[2,1], index: 2, kind: input, shape index: {}]   ;;  %s231_s3 = inlined_call_operand.vmem [shape: f32[2,1], index: 3, kind: output, shape index: {}]  }
   0x1   :  { %s15_s14 = sshll.u32 %s228_s0, 4  ;;  %s16_s14 = int_to_ptr.hbm [resolvable:$true] %s15_s14 }
   0x2   :  { %9 = vsyncpa [#allocation5], 0  ;;  %s175_s15 = smov [#allocation2]   ;;  %s26_s19 = sshll.u32 %s229_s1, 4  ;;  %s27_s19 = int_to_ptr.hbm [resolvable:$true] %s26_s19 }
   0x3   :  { %s17_s16 = sshll.u32 %s175_s15, 4  ;;  %s176_s20 = smov [#allocation4]   ;;  %s18_s16 = int_to_ptr.vmem [resolvable:$true] %s17_s16 }
   0x4   :  { %20 = dma.hbm_to_vmem [thread:$0]  %s16_s14, 256, %s18_s16, [#allocation3]  }
   0x5   :  { %s28_s21 = sshll.u32 %s176_s20, 4  ;;  %s29_s21 = int_to_ptr.vmem [resolvable:$true] %s28_s21 }
   0x6   :  { %31 = dma.hbm_to_vmem [thread:$0]  %s27_s19, 256, %s29_s21, [#allocation5]  }
   0x7   :  { %171 = dma.done.wait [#allocation3], 256  }
   0x8   :  { %172 = vsyncadd [#allocation3], 4294967040 }
   0x9   :  { %173 = dma.done.wait [#allocation5], 256  }
   0xa   :  { %174 = vsyncadd [#allocation5], 4294967040  ;;  %v177_v0 = vmov 0   ;;  %v52_v1 = vld [vmem:[%s230_s2] sm:$0x3]  ;;  %v50_v6 = vld [vmem:[#allocation4] sm:$0xff] }
   0xb   :  { %122 = vset.pattern.permute.xlu0 %v177_v0  ;;  %v178_v2 = vmov 269488144   ;;  %v51_v7 = vld [vmem:[#allocation4 + $0x8] sm:$0xff]  ;;  %v48_v9 = vld [vmem:[#allocation2] sm:$0xff]  ;;  %v49_v10 = vld [vmem:[#allocation2 + $0x8] sm:$0xff]  ;;  %vm46_vm0 = vcmask 1024  }
   0xc   :  { %55 = vperm.xlu0 %122, %v52_v1   ;;  %v58_v3 = vunpack.c.l.s4 %v178_v2  ;;  %v179_v13 = vmov 0.0   ;;  %vm90_vm1 = vcmask 1041408  }
   0xd   :  { %47 = vst.msk [vmem:[%s231_s3] sm:$0x3] %vm46_vm0, %v179_v13 }
   0xe   :  { %v59_v4 = vunpack.c.0.s8 %v58_v3 }
  0x14   :  { %v66_v41 = vld [vmem:[%s231_s3] sm:$0x3] }
  0x7e   :  { %v56_v5 = vpop.permute.xlu0 %55 }
  0x7f   :  { %v60_v8 = vperm.slane %v56_v5, %v59_v4 }
  0x81   :  { %v62_v11 = vmul.f32 %v60_v8, %v50_v6  ;;  %v63_v12 = vmul.f32 %v60_v8, %v51_v7 }
  0x83   :  { %v64_v14 = vadd.f32 %v62_v11, %v48_v9  ;;  %v65_v15 = vadd.f32 %v63_v12, %v49_v10 }
  0x85   :  { %v67_v16 = vmul.f32 %v64_v14, %v64_v14  ;;  %v68_v17 = vmul.f32 %v65_v15, %v65_v15 }
  0x87   :  { %71 = vst [vmem:[#allocation1] ss:$4 sm:$0xff] %v67_v16 }
  0x88   :  { %73 = vst [vmem:[#allocation1 + $0x20] ss:$4 sm:$0xff] %v68_v17 }
  0x8e   :  { %v74_v18 = vld.sshfl [vmem:[#allocation1] sm:$0xff pattern:$0x73625140]  ;;  %v75_v19 = vld.sshfl [vmem:[#allocation1 + $0x8] sm:$0xff pattern:$0x73625140] }
  0x8f   :  { %v76_v20 = vld.sshfl [vmem:[#allocation1 + $0x10] sm:$0xff pattern:$0x73625140]  ;;  %v91_v21 = vsel %vm90_vm1, %v74_v18, 0.0  ;;  %v92_v22 = vsel %vm90_vm1, %v75_v19, 0.0 }
  0x90   :  { %v77_v23 = vld.sshfl [vmem:[#allocation1 + $0x18] sm:$0xff pattern:$0x73625140]  ;;  %v93_v24 = vadd.f32 %v92_v22, %v91_v21  ;;  %v94_v25 = vsel %vm90_vm1, %v76_v20, 0.0 }
  0x91   :  { %v78_v26 = vld.sshfl [vmem:[#allocation1 + $0x20] sm:$0xff pattern:$0x73625140]  ;;  %v96_v28 = vsel %vm90_vm1, %v77_v23, 0.0 }
  0x92   :  { %v95_v27 = vadd.f32 %v94_v25, %v93_v24  ;;  %v79_v29 = vld.sshfl [vmem:[#allocation1 + $0x28] sm:$0xff pattern:$0x73625140]  ;;  %v98_v31 = vsel %vm90_vm1, %v78_v26, 0.0 }
  0x93   :  { %v80_v32 = vld.sshfl [vmem:[#allocation1 + $0x30] sm:$0xff pattern:$0x73625140]  ;;  %v100_v34 = vsel %vm90_vm1, %v79_v29, 0.0 }
  0x94   :  { %v97_v30 = vadd.f32 %v96_v28, %v95_v27  ;;  %v81_v35 = vld.sshfl [vmem:[#allocation1 + $0x38] sm:$0xff pattern:$0x73625140]  ;;  %v102_v37 = vsel %vm90_vm1, %v80_v32, 0.0 }
  0x95   :  { %v104_v39 = vsel %vm90_vm1, %v81_v35, 0.0 }
  0x96   :  { %v99_v33 = vadd.f32 %v98_v31, %v97_v30 }
  0x98   :  { %v101_v36 = vadd.f32 %v100_v34, %v99_v33 }
  0x9a   :  { %v103_v38 = vadd.f32 %v102_v37, %v101_v36 }
  0x9c   :  { %v105_v40 = vadd.f32 %v104_v39, %v103_v38 }
  0x9e   :  { %106 = vadd.xlane.f32.xlu0 %v105_v40 }
 0x111   :  { %v107_v42 = vpop.xlane.xlu0 %106 }
 0x112   :  { %v108_v43 = vadd.f32 %v107_v42, %v66_v41 }
 0x114   :  { %110 = vst.msk [vmem:[%s231_s3] sm:$0x3] %vm46_vm0, %v108_v43 }
 0x115   :  { %115 = vsyncpa [#allocation3], 1 }
 0x116   :  { %116 = vsyncpa [#allocation5], 1 }

</bundles_post_ra>
